<compile_context>
chip_gen: v7x
topology: tpu7x:2x2x1
jax: 0.10.0
libtpu: 0.0.40
codegen_flags: <defaults>
</compile_context>

<pallas_src>
import jax
import jax.numpy as jnp
from jax import lax
from jax.experimental import pallas as pl
from jax.experimental.pallas import tpu as pltpu


def _round_up(x, m):
    return (x + m - 1) // m * m


def critic_kernel(obs_ref, w1_ref, b1_ref, w2_ref, b2_ref, w3_ref, b3_ref, out_ref):
    """Fused 3-layer MLP critic for one (bt, obs_dim) batch tile.

    bf16 MXU operands, f32 accumulation, f32 elementwise epilogues.
    """
    x = obs_ref[...].astype(jnp.bfloat16)  # (bt, D)

    # fc1 + ReLU
    h1 = jnp.dot(x, w1_ref[...], preferred_element_type=jnp.float32) + b1_ref[...]
    h1 = jnp.maximum(h1, 0.0)

    # fc2 + ReLU
    h2 = jnp.dot(h1.astype(jnp.bfloat16), w2_ref[...],
                 preferred_element_type=jnp.float32) + b2_ref[...]
    h2 = jnp.maximum(h2, 0.0)

    # out layer: contract w3 (8, h_pad) with h2 (bt, h_pad) over the hidden axis of
    # both operands -> (8, bt).  No in-kernel transpose; row 0 holds the real result
    # and the store is a lane-dense (1, bt) row.
    v = lax.dot_general(
        w3_ref[...], h2.astype(jnp.bfloat16),
        dimension_numbers=(((1,), (1,)), ((), ())),
        preferred_element_type=jnp.float32)
    out_ref[...] = (v[0:1, :] + b3_ref[0, 0]).astype(out_ref.dtype)


def prepare_params(params):
    """One-time padding/casting of the Linear parameters (hoisted out of the forward).

    Weights -> bf16, hidden dim zero-padded to a multiple of 128 lanes; biases -> f32;
    final-layer weight stored as an (8, h_pad) slab (row 0 real) for a full-sublane
    MXU LHS tile; final bias as a (1, 1) f32 SMEM scalar.
    """
    w1, b1, w2, b2, w3, b3 = params
    D, H = w1.shape
    h_pad = _round_up(H, 128)
    bf16, f32 = jnp.bfloat16, jnp.float32

    w1_p = jnp.zeros((D, h_pad), bf16).at[:, :H].set(w1.astype(bf16))
    b1_p = jnp.zeros((1, h_pad), f32).at[:, :H].set(jnp.reshape(b1, (1, H)).astype(f32))
    w2_p = jnp.zeros((h_pad, h_pad), bf16).at[:H, :H].set(w2.astype(bf16))
    b2_p = jnp.zeros((1, h_pad), f32).at[:, :H].set(jnp.reshape(b2, (1, H)).astype(f32))
    w3_p = jnp.zeros((8, h_pad), bf16).at[0, :H].set(jnp.reshape(w3, (H,)).astype(bf16))
    b3_p = jnp.reshape(b3, (1, 1)).astype(f32)
    return (w1_p, b1_p, w2_p, b2_p, w3_p, b3_p)


def critic_forward(obs, prepared_params, *, block_b=1024):
    """obs: (B, obs_dim) -> value estimates of shape (B,) float32."""
    w1_p, b1_p, w2_p, b2_p, w3_p, b3_p = prepared_params
    B, D = obs.shape
    d_in, h_pad = w1_p.shape
    assert D == d_in, f"obs_dim mismatch: obs has {D}, params expect {d_in}"

    # Batch tiling: multiples of 128; when the whole batch fits one tile but spans
    # >= 2 vreg-rows of tiles, split it so the parallel grid has >= 2 steps (v7x 2-TC).
    b_ceil = _round_up(max(B, 1), 128)
    bt = min(_round_up(block_b, 128), b_ceil)
    if bt >= b_ceil and b_ceil >= 256:
        bt = _round_up(b_ceil // 2, 128)
    b_pad = _round_up(B, bt)
    grid = b_pad // bt

    obs_p = obs.astype(jnp.float32)
    if b_pad != B:
        obs_p = jnp.pad(obs_p, ((0, b_pad - B), (0, 0)))

    flops = 2 * b_pad * (D * h_pad + h_pad * h_pad + 8 * h_pad)
    bytes_accessed = (
        4 * b_pad * D                                        # obs (f32)
        + 2 * (D * h_pad + h_pad * h_pad + 8 * h_pad)        # weights (bf16)
        + 4 * (2 * h_pad + 1)                                # biases (f32)
        + 4 * b_pad                                          # output (f32)
    )

    out_row = pl.pallas_call(
        critic_kernel,
        out_shape=jax.ShapeDtypeStruct((1, b_pad), jnp.float32),
        grid_spec=pltpu.PrefetchScalarGridSpec(
            num_scalar_prefetch=0,
            grid=(grid,),
            in_specs=[
                pl.BlockSpec((bt, D), lambda i: (i, 0)),            # obs: pipelined
                pl.BlockSpec((d_in, h_pad), lambda i: (0, 0)),      # w1: resident
                pl.BlockSpec((1, h_pad), lambda i: (0, 0)),         # b1: resident
                pl.BlockSpec((h_pad, h_pad), lambda i: (0, 0)),     # w2: resident
                pl.BlockSpec((1, h_pad), lambda i: (0, 0)),         # b2: resident
                pl.BlockSpec((8, h_pad), lambda i: (0, 0)),         # w3: resident
                pl.BlockSpec(memory_space=pltpu.MemorySpace.SMEM),  # b3: scalar
            ],
            out_specs=pl.BlockSpec((1, bt), lambda i: (0, i)),      # lane-dense out
        ),
        compiler_params=pltpu.CompilerParams(
            dimension_semantics=("parallel",),
            vmem_limit_bytes=32 * 1024 * 1024,
        ),
        cost_estimate=pl.CostEstimate(
            flops=flops, transcendentals=0, bytes_accessed=bytes_accessed
        ),
    )(obs_p, w1_p, b1_p, w2_p, b2_p, w3_p, b3_p)

    # .squeeze(-1) from the PyTorch forward + drop batch padding.
    return out_row[0, :B]


def init_params(key, obs_dim, hidden_dim):
    """Deterministic init mimicking nn.Linear's U(-1/sqrt(fan_in), 1/sqrt(fan_in)).
    Weights stored as (in_features, out_features); biases as (1, out_features)."""
    ks = jax.random.split(key, 6)

    def lin(kw, kb, fan_in, fan_out):
        bound = 1.0 / jnp.sqrt(jnp.float32(fan_in))
        w = jax.random.uniform(kw, (fan_in, fan_out), jnp.float32, -bound, bound)
        b = jax.random.uniform(kb, (1, fan_out), jnp.float32, -bound, bound)
        return w, b

    w1, b1 = lin(ks[0], ks[1], obs_dim, hidden_dim)
    w2, b2 = lin(ks[2], ks[3], hidden_dim, hidden_dim)
    w3, b3 = lin(ks[4], ks[5], hidden_dim, 1)
    return (w1, b1, w2, b2, w3, b3)


if __name__ == "__main__":
    key = jax.random.PRNGKey(0)
    k_obs, k_par = jax.random.split(key)

    batch, obs_dim, hidden_dim = 8, 16, 32
    obs = jax.random.normal(k_obs, (batch, obs_dim), jnp.float32)
    params = init_params(k_par, obs_dim, hidden_dim)
    prepared = prepare_params(params)   # one-time padding / bf16 cast

    values = critic_forward(obs, prepared)
    jax.block_until_ready(values)

    # Reference check against plain-JAX f32 forward (same math as the PyTorch module).
    w1, b1, w2, b2, w3, b3 = params
    ref = jnp.maximum(obs @ w1 + b1, 0.0)
    ref = jnp.maximum(ref @ w2 + b2, 0.0)
    ref = (ref @ w3 + b3)[:, 0]

    assert values.shape == (batch,)
    # Tolerance covers bf16 MXU-operand rounding (f32 accumulation) vs the f32 reference.
    assert jnp.allclose(values, ref, atol=5e-2, rtol=5e-2), (
        f"max abs err {jnp.max(jnp.abs(values - ref))}"
    )

    print("KERNEL_OK")
</pallas_src>

<mosaic_0001>
module attributes {stable_mosaic.version = 11 : i64} {
  func.func @critic_kernel(%arg0: i32, %arg1: memref<128x16xf32, #tpu.memory_space<vmem>>, %arg2: memref<16x128xbf16, #tpu.memory_space<vmem>>, %arg3: memref<1x128xf32, #tpu.memory_space<vmem>>, %arg4: memref<128x128xbf16, #tpu.memory_space<vmem>>, %arg5: memref<1x128xf32, #tpu.memory_space<vmem>>, %arg6: memref<8x128xbf16, #tpu.memory_space<vmem>>, %arg7: memref<1x1xf32, #tpu.memory_space<smem>>, %arg8: memref<1x128xf32, #tpu.memory_space<vmem>>) attributes {dimension_semantics = [#tpu.dimension_semantics<parallel>], iteration_bounds = array<i64: 1>, scalar_prefetch = 0 : i64, scratch_operands = 0 : i64, tpu.core_type = #tpu.core_type<tc>, window_params = [{transform_indices = @transform_0, window_bounds = array<i64: 128, 16>}, {pipeline_mode = #tpu.pipeline_mode<synchronous>, transform_indices = @transform_1, window_bounds = array<i64: 16, 128>}, {pipeline_mode = #tpu.pipeline_mode<synchronous>, transform_indices = @transform_2, window_bounds = array<i64: 1, 128>}, {pipeline_mode = #tpu.pipeline_mode<synchronous>, transform_indices = @transform_3, window_bounds = array<i64: 128, 128>}, {pipeline_mode = #tpu.pipeline_mode<synchronous>, transform_indices = @transform_4, window_bounds = array<i64: 1, 128>}, {pipeline_mode = #tpu.pipeline_mode<synchronous>, transform_indices = @transform_5, window_bounds = array<i64: 8, 128>}, {transform_indices = @transform_6, window_bounds = array<i64: 1, 1>}, {transform_indices = @transform_7, window_bounds = array<i64: 1, 128>}]} {
    %c0 = arith.constant 0 : index
    %c0_0 = arith.constant 0 : index
    %0 = vector.load %arg1[%c0, %c0_0] : memref<128x16xf32, #tpu.memory_space<vmem>>, vector<128x16xf32>
    %1 = arith.truncf %0 : vector<128x16xf32> to vector<128x16xbf16>
    %c0_1 = arith.constant 0 : index
    %c0_2 = arith.constant 0 : index
    %2 = vector.load %arg2[%c0_1, %c0_2] : memref<16x128xbf16, #tpu.memory_space<vmem>>, vector<16x128xbf16>
    %cst = arith.constant dense<0.000000e+00> : vector<128x128xf32>
    %3 = tpu.matmul %1, %2, %cst {dimension_numbers = #tpu.dot_dimension_numbers<[1], [0], [0], [1], [0, 0, 1, 1], [], []>} : vector<128x16xbf16>, vector<16x128xbf16>, vector<128x128xf32> -> vector<128x128xf32>
    %c0_3 = arith.constant 0 : index
    %c0_4 = arith.constant 0 : index
    %4 = vector.load %arg3[%c0_3, %c0_4] : memref<1x128xf32, #tpu.memory_space<vmem>>, vector<1x128xf32>
    %5 = vector.broadcast %4 : vector<1x128xf32> to vector<128x128xf32>
    %6 = arith.addf %3, %5 : vector<128x128xf32>
    %cst_5 = arith.constant 0.000000e+00 : f32
    %7 = vector.broadcast %cst_5 : f32 to vector<128x128xf32>
    %8 = arith.maximumf %6, %7 : vector<128x128xf32>
    %9 = arith.truncf %8 : vector<128x128xf32> to vector<128x128xbf16>
    %c0_6 = arith.constant 0 : index
    %c0_7 = arith.constant 0 : index
    %10 = vector.load %arg4[%c0_6, %c0_7] : memref<128x128xbf16, #tpu.memory_space<vmem>>, vector<128x128xbf16>
    %cst_8 = arith.constant dense<0.000000e+00> : vector<128x128xf32>
    %11 = tpu.matmul %9, %10, %cst_8 {dimension_numbers = #tpu.dot_dimension_numbers<[1], [0], [0], [1], [0, 0, 1, 1], [], []>} : vector<128x128xbf16>, vector<128x128xbf16>, vector<128x128xf32> -> vector<128x128xf32>
    %c0_9 = arith.constant 0 : index
    %c0_10 = arith.constant 0 : index
    %12 = vector.load %arg5[%c0_9, %c0_10] : memref<1x128xf32, #tpu.memory_space<vmem>>, vector<1x128xf32>
    %13 = vector.broadcast %12 : vector<1x128xf32> to vector<128x128xf32>
    %14 = arith.addf %11, %13 : vector<128x128xf32>
    %cst_11 = arith.constant 0.000000e+00 : f32
    %15 = vector.broadcast %cst_11 : f32 to vector<128x128xf32>
    %16 = arith.maximumf %14, %15 : vector<128x128xf32>
    %c0_12 = arith.constant 0 : index
    %c0_13 = arith.constant 0 : index
    %17 = vector.load %arg6[%c0_12, %c0_13] : memref<8x128xbf16, #tpu.memory_space<vmem>>, vector<8x128xbf16>
    %18 = arith.truncf %16 : vector<128x128xf32> to vector<128x128xbf16>
    %cst_14 = arith.constant dense<0.000000e+00> : vector<8x128xf32>
    %19 = tpu.matmul %17, %18, %cst_14 {dimension_numbers = #tpu.dot_dimension_numbers<[1], [1], [0], [0], [0, 0, 1, 0], [], []>} : vector<8x128xbf16>, vector<128x128xbf16>, vector<8x128xf32> -> vector<8x128xf32>
    %20 = vector.extract_strided_slice %19 {offsets = [0, 0], sizes = [1, 128], strides = [1, 1]} : vector<8x128xf32> to vector<1x128xf32>
    %c0_15 = arith.constant 0 : index
    %c0_16 = arith.constant 0 : index
    %21 = memref.load %arg7[%c0_15, %c0_16] : memref<1x1xf32, #tpu.memory_space<smem>>
    %22 = vector.broadcast %21 : f32 to vector<1x128xf32>
    %23 = arith.addf %20, %22 : vector<1x128xf32>
    %c0_17 = arith.constant 0 : index
    %c0_18 = arith.constant 0 : index
    %24 = vector.load %arg8[%c0_17, %c0_18] : memref<1x128xf32, #tpu.memory_space<vmem>>, vector<1x128xf32>
    tpu.vector_store %arg8[%c0_17, %c0_18], %23 {strides = array<i32>} : memref<1x128xf32, #tpu.memory_space<vmem>>, vector<1x128xf32>,
    return
  }
  func.func @transform_0(%arg0: i32) -> (i32, i32) {
    %c0_i32 = arith.constant 0 : i32
    %c0_i32_0 = arith.constant 0 : i32
    return %arg0, %c0_i32 : i32, i32
  }
  func.func @transform_1(%arg0: i32) -> (i32, i32) {
    %c0_i32 = arith.constant 0 : i32
    %c0_i32_0 = arith.constant 0 : i32
    %c0_i32_1 = arith.constant 0 : i32
    return %c0_i32, %c0_i32_0 : i32, i32
  }
  func.func @transform_2(%arg0: i32) -> (i32, i32) {
    %c0_i32 = arith.constant 0 : i32
    %c0_i32_0 = arith.constant 0 : i32
    %c0_i32_1 = arith.constant 0 : i32
    return %c0_i32, %c0_i32_0 : i32, i32
  }
  func.func @transform_3(%arg0: i32) -> (i32, i32) {
    %c0_i32 = arith.constant 0 : i32
    %c0_i32_0 = arith.constant 0 : i32
    %c0_i32_1 = arith.constant 0 : i32
    return %c0_i32, %c0_i32_0 : i32, i32
  }
  func.func @transform_4(%arg0: i32) -> (i32, i32) {
    %c0_i32 = arith.constant 0 : i32
    %c0_i32_0 = arith.constant 0 : i32
    %c0_i32_1 = arith.constant 0 : i32
    return %c0_i32, %c0_i32_0 : i32, i32
  }
  func.func @transform_5(%arg0: i32) -> (i32, i32) {
    %c0_i32 = arith.constant 0 : i32
    %c0_i32_0 = arith.constant 0 : i32
    %c0_i32_1 = arith.constant 0 : i32
    return %c0_i32, %c0_i32_0 : i32, i32
  }
  func.func @transform_6(%arg0: i32) -> (i32, i32) {
    %c0_i32 = arith.constant 0 : i32
    %c0_i32_0 = arith.constant 0 : i32
    %c0_i32_1 = arith.constant 0 : i32
    return %c0_i32, %c0_i32_0 : i32, i32
  }
  func.func @transform_7(%arg0: i32) -> (i32, i32) {
    %c0_i32 = arith.constant 0 : i32
    %c0_i32_0 = arith.constant 0 : i32
    return %c0_i32, %arg0 : i32, i32
  }
}

</mosaic_0001>

<bundles_post_ra>
// kernel: tpu_custom_call.1
= control target key start
LH: loop header
LB: loop body
LE: loop exit
PB: predicated region body
PF: predicated region fallthrough
CT: control target
= control target key end

     0   :  { %vm68_vm0 = vcmask 130048   ;;  %s783_s0 = inlined_call_operand.vmem [shape: f32[128,16], index: 0, kind: input, shape index: {}]   ;;  %s784_s1 = inlined_call_operand.vmem [shape: bf16[16,128], index: 1, kind: input, shape index: {}]   ;;  %s785_s2 = inlined_call_operand.vmem [shape: f32[1,128], index: 2, kind: input, shape index: {}]   ;;  %s786_s3 = inlined_call_operand.vmem [shape: bf16[128,128], index: 3, kind: input, shape index: {}]   ;;  %s787_s4 = inlined_call_operand.vmem [shape: f32[1,128], index: 4, kind: input, shape index: {}]   ;;  %s788_s5 = inlined_call_operand.vmem [shape: bf16[8,128], index: 5, kind: input, shape index: {}]   ;;  %s789_s6 = inlined_call_operand.<no memory space> [shape: f32[1,1], index: 6, kind: input, shape index: {}]   ;;  %s790_s7 = inlined_call_operand.hbm [shape: f32[1,128], index: 7, kind: output, shape index: {}]  }
   0x1   :  { %v591_v0 = vld [vmem:[%s784_s1] sm:$0xff]   ;;  %v30_v2 = vld [vmem:[%s783_s0 + $0x8] sm:$0xff]  ;;  %v31_v3 = vld [vmem:[%s783_s0 + $0x10] sm:$0xff] }
   0x2   :  { %v29_v1 = vld [vmem:[%s783_s0] sm:$0xff]  ;;  %518 = vmatprep.subr.bf16.mxu1 %v591_v0  ;;  %v32_v5 = vld [vmem:[%s783_s0 + $0x18] sm:$0xff]  ;;  %v34_v7 = vld [vmem:[%s783_s0 + $0x28] sm:$0xff] }
   0x3   :  { %v45_v4 = vpack.c.bf16 %v30_v2, %v29_v1  ;;  %v33_v6 = vld [vmem:[%s783_s0 + $0x20] sm:$0xff]  ;;  %519 = vmatpush3.bf16.msra.mxu1 %v591_v0  ;;  %v46_v8 = vpack.c.bf16 %v32_v5, %v31_v3  ;;  %v35_v10 = vld [vmem:[%s783_s0 + $0x30] sm:$0xff]  ;;  %v36_v11 = vld [vmem:[%s783_s0 + $0x38] sm:$0xff] }
   0x4   :  { %v47_v9 = vpack.c.bf16 %v34_v7, %v33_v6  ;;  %v37_v12 = vld [vmem:[%s783_s0 + $0x40] sm:$0xff]  ;;  %v38_v13 = vld [vmem:[%s783_s0 + $0x48] sm:$0xff]  ;;  %v48_v16 = vpack.c.bf16 %v36_v11, %v35_v10  ;;  %v594_v18 = vld [vmem:[%s786_s3 + $0x10] sm:$0xff]  }
   0x5   :  { %520 = vmatprep.mubr.msk.bf16.mxu1 %vm68_vm0, %v45_v4  ;;  %v592_v14 = vld [vmem:[%s786_s3] sm:$0xff]   ;;  %v593_v15 = vld [vmem:[%s786_s3 + $0x8] sm:$0xff]   ;;  %v49_v17 = vpack.c.bf16 %v38_v13, %v37_v12 }
   0x6   :  { %521 = vmatmul.mubr.msk.bf16.vlgmr.msra.gmra.mrb[0].mxu1 %vm68_vm0, %v46_v8  ;;  %536 = vmatprep.subr.bf16.mxu1 %v592_v14 }
   0x7   :  { %524 = vmatprep.mubr.msk.bf16.mxu1 %vm68_vm0, %v47_v9  ;;  %537 = vmatpush3.bf16.msra.mxu1 %v592_v14 }
   0x8   :  { %538 = vmatprep.subr.bf16.mxu1 %v593_v15 }
   0x9   :  { %13 = vsyncpa [#allocation4], 0  ;;  %v39_v19 = vld [vmem:[%s783_s0 + $0x50] sm:$0xff]  ;;  %v40_v20 = vld [vmem:[%s783_s0 + $0x58] sm:$0xff]  ;;  %vm625_vm1 = vmmov 0   ;;  %s626_s30 = smov [#allocation3]  }
   0xa   :  { %v41_v21 = vld [vmem:[%s783_s0 + $0x60] sm:$0xff]  ;;  %v42_v22 = vld [vmem:[%s783_s0 + $0x68] sm:$0xff]  ;;  %v595_v23 = vld [vmem:[%s786_s3 + $0x18] sm:$0xff]   ;;  %v50_v24 = vpack.c.bf16 %v40_v20, %v39_v19  ;;  %s457_s8 = sshll.u32 %s626_s30, 4  ;;  %s458_s8 = int_to_ptr.vmem [resolvable:$true] %s457_s8 }
   0xb   :  { %539 = vmatpush3.bf16.msra.mxu1 %v593_v15  ;;  %v51_v25 = vpack.c.bf16 %v42_v22, %v41_v21  ;;  %v596_v26 = vld [vmem:[%s786_s3 + $0x20] sm:$0xff]   ;;  %v43_v27 = vld [vmem:[%s783_s0 + $0x70] sm:$0xff]  ;;  %v44_v28 = vld [vmem:[%s783_s0 + $0x78] sm:$0xff]  ;;  %s600_s9 = scalar_lea.vmem %s458_s8, 16  ;;  %s604_s10 = scalar_lea.vmem %s458_s8, 32 }
   0xc   :  { %540 = vmatprep.subr.bf16.mxu1 %v594_v18  ;;  %v597_v29 = vld [vmem:[%s786_s3 + $0x28] sm:$0xff]   ;;  %v52_v30 = vpack.c.bf16 %v44_v28, %v43_v27  ;;  %v598_v31 = vld [vmem:[%s786_s3 + $0x30] sm:$0xff]   ;;  %v599_v32 = vld [vmem:[%s786_s3 + $0x38] sm:$0xff]   ;;  %p601_p0 = scmp.ne.s32.totalorder %s458_s8, %s600_s9  ;;  %p605_p1 = scmp.lt.s32.totalorder %s458_s8, %s458_s8 }
   0xd   :  { %v465_v33 = vld [vmem:[%s785_s2] ss:$0 sm:$0xff]  ;;  %p606_p2 = scmp.lt.s32.totalorder %s604_s10, %s600_s9 }
   0xe   :  { %525 = vmatmul.mubr.msk.bf16.gmra.mrb[4].mxu1 %vm68_vm0, %v48_v16  ;;  %v475_v27 = vld [vmem:[%s787_s4] ss:$0 sm:$0xff] }
   0xf   :  { %528 = vmatprep.mubr.msk.bf16.mxu1 %vm68_vm0, %v49_v17  ;;  %541 = vmatpush3.bf16.msra.mxu1 %v594_v18  ;;  %p607_p3 = por %p606_p2, %p605_p1 }
  0x10   :  { %542 = vmatprep.subr.bf16.mxu1 %v595_v23 }
  0x11   :  { %p608_p4 = pnand %p607_p3, %p601_p0 }
  0x13   :  { %543 = vmatpush3.bf16.msra.mxu1 %v595_v23 }
  0x14   :  { %544 = vmatprep.subr.bf16.mxu1 %v596_v26 }
  0x16   :  { %529 = vmatmul.mubr.msk.bf16.gmra.mrb[8].mxu1 %vm68_vm0, %v50_v24 }
  0x17   :  { %532 = vmatprep.mubr.msk.bf16.mxu1 %vm68_vm0, %v51_v25  ;;  %545 = vmatpush3.bf16.msra.mxu1 %v596_v26  ;;  %v624_v26 = vmov 0.0  }
  0x18   :  { %546 = vmatprep.subr.bf16.mxu1 %v597_v29  ;;  %568 = vmatprep.subr.bf16.mxu0 %v624_v26 }
  0x19   :  { %584 = vmatprep.mubr.msk.bf16.mxu0 %vm625_vm1, %v624_v26 }
  0x1b   :  { %547 = vmatpush3.bf16.msra.mxu1 %v597_v29 }
  0x1c   :  { %548 = vmatprep.subr.bf16.mxu1 %v598_v31 }
  0x1e   :  { %533 = vmatmul.mubr.msk.bf16.gmra.mrb[12].mxu1 %vm68_vm0, %v52_v30 }
  0x1f   :  { %549 = vmatpush3.bf16.msra.mxu1 %v598_v31 }
  0x20   :  { %550 = vmatprep.subr.bf16.mxu1 %v599_v32 }
  0x23   :  { %551 = vmatpush3.bf16.msra.mxu1 %v599_v32 }
  0xd9   :  { %v522_v34 = vpop.f32.mrb[0].mxu1 }
  0xda   :  { %v136_v35 = vadd.f32 %v522_v34, %v465_v33  ;;  %v127_v36 = vpop.f32.mrb[1].mxu1 }
  0xdb   :  { %v128_v37 = vadd.f32 %v465_v33, %v127_v36  ;;  %v523_v38 = vpop.f32.mrb[2].mxu1 }
  0xdc   :  { %v139_v39 = vadd.f32 %v523_v38, %v465_v33  ;;  %v130_v40 = vpop.f32.mrb[3].mxu1  ;;  %v192_v42 = vmax.f32 %v136_v35, 0.0 }
  0xdd   :  { %v131_v41 = vadd.f32 %v465_v33, %v130_v40  ;;  %v190_v44 = vmax.f32 %v128_v37, 0.0 }
  0xde   :  { %v193_v43 = vmax.f32 %v139_v39, 0.0 }
  0xdf   :  { %v191_v45 = vmax.f32 %v131_v41, 0.0 }
  0xe0   :  { %v207_v46 = vpack.c.bf16 %v193_v43, %v192_v42 }
  0xe1   :  { %v206_v47 = vpack.c.bf16 %v191_v45, %v190_v44  ;;  %v526_v48 = vpop.f32.mrb[4].mxu1 }
  0xe2   :  { %v152_v49 = vadd.f32 %v526_v48, %v465_v33  ;;  %v143_v50 = vpop.f32.mrb[5].mxu1 }
  0xe3   :  { %v144_v51 = vadd.f32 %v465_v33, %v143_v50  ;;  %552 = vmatprep.mubr.bf16.mxu1 %v206_v47  ;;  %v527_v52 = vpop.f32.mrb[6].mxu1 }
  0xe4   :  { %v196_v53 = vmax.f32 %v152_v49, 0.0  ;;  %v155_v54 = vadd.f32 %v527_v52, %v465_v33  ;;  %553 = vmatmul.mubr.bf16.vlgmr.msra.gmra.mrb[16].mxu1 %v207_v46  ;;  %v146_v55 = vpop.f32.mrb[7].mxu1 }
  0xe5   :  { %v194_v56 = vmax.f32 %v144_v51, 0.0  ;;  %v147_v57 = vadd.f32 %v465_v33, %v146_v55 }
  0xe6   :  { %v197_v58 = vmax.f32 %v155_v54, 0.0 }
  0xe7   :  { %v195_v59 = vmax.f32 %v147_v57, 0.0 }
  0xe8   :  { %v209_v60 = vpack.c.bf16 %v197_v58, %v196_v53 }
  0xe9   :  { %v208_v61 = vpack.c.bf16 %v195_v59, %v194_v56  ;;  %v530_v62 = vpop.f32.mrb[8].mxu1 }
  0xea   :  { %v168_v63 = vadd.f32 %v530_v62, %v465_v33  ;;  %v159_v0 = vpop.f32.mrb[9].mxu1 }
  0xeb   :  { %556 = vmatprep.mubr.bf16.mxu1 %v208_v61  ;;  %v160_v1 = vadd.f32 %v465_v33, %v159_v0  ;;  %v531_v2 = vpop.f32.mrb[10].mxu1 }
  0xec   :  { %557 = vmatmul.mubr.bf16.gmra.mrb[20].mxu1 %v209_v60  ;;  %v200_v3 = vmax.f32 %v168_v63, 0.0  ;;  %v171_v4 = vadd.f32 %v531_v2, %v465_v33  ;;  %v162_v5 = vpop.f32.mrb[11].mxu1 }
  0xed   :  { %v198_v6 = vmax.f32 %v160_v1, 0.0  ;;  %v163_v7 = vadd.f32 %v465_v33, %v162_v5 }
  0xee   :  { %v201_v8 = vmax.f32 %v171_v4, 0.0 }
  0xef   :  { %v199_v9 = vmax.f32 %v163_v7, 0.0 }
  0xf0   :  { %v211_v10 = vpack.c.bf16 %v201_v8, %v200_v3 }
  0xf1   :  { %v210_v11 = vpack.c.bf16 %v199_v9, %v198_v6  ;;  %v534_v12 = vpop.f32.mrb[12].mxu1 }
  0xf2   :  { %v184_v13 = vadd.f32 %v534_v12, %v465_v33  ;;  %v175_v14 = vpop.f32.mrb[13].mxu1 }
  0xf3   :  { %560 = vmatprep.mubr.bf16.mxu1 %v210_v11  ;;  %v176_v15 = vadd.f32 %v465_v33, %v175_v14  ;;  %v535_v16 = vpop.f32.mrb[14].mxu1 }
  0xf4   :  { %561 = vmatmul.mubr.bf16.gmra.mrb[24].mxu1 %v211_v10  ;;  %v204_v17 = vmax.f32 %v184_v13, 0.0  ;;  %v187_v18 = vadd.f32 %v535_v16, %v465_v33  ;;  %v178_v19 = vpop.f32.mrb[15].mxu1 }
  0xf5   :  { %v202_v20 = vmax.f32 %v176_v15, 0.0  ;;  %v179_v21 = vadd.f32 %v465_v33, %v178_v19 }
  0xf6   :  { %v205_v22 = vmax.f32 %v187_v18, 0.0 }
  0xf7   :  { %v203_v23 = vmax.f32 %v179_v21, 0.0  ;;  %v448_v21 = vstv %s789_s6 }
  0xf8   :  { %v213_v24 = vpack.c.bf16 %v205_v22, %v204_v17 }
  0xf9   :  { %v212_v25 = vpack.c.bf16 %v203_v23, %v202_v20  ;;  %v398_v20 = vld [vmem:[%s788_s5] sm:$0xf] }
  0xfb   :  { %564 = vmatprep.mubr.bf16.mxu1 %v212_v25 }
  0xfc   :  { %565 = vmatmul.mubr.bf16.gmra.mrb[28].mxu1 %v213_v24 }
 0x1b7   :  { %v554_v28 = vpop.f32.mrb[16].mxu1 }
 0x1b8   :  { %v328_v29 = vadd.f32 %v554_v28, %v475_v27  ;;  %v319_v30 = vpop.f32.mrb[17].mxu1 }
 0x1b9   :  { %v320_v31 = vadd.f32 %v475_v27, %v319_v30  ;;  %v555_v32 = vpop.f32.mrb[18].mxu1 }
 0x1ba   :  { %v331_v33 = vadd.f32 %v555_v32, %v475_v27  ;;  %v322_v34 = vpop.f32.mrb[19].mxu1  ;;  %v384_v36 = vmax.f32 %v328_v29, 0.0 }
 0x1bb   :  { %v323_v35 = vadd.f32 %v475_v27, %v322_v34  ;;  %v382_v38 = vmax.f32 %v320_v31, 0.0 }
 0x1bc   :  { %v385_v37 = vmax.f32 %v331_v33, 0.0 }
 0x1bd   :  { %v383_v39 = vmax.f32 %v323_v35, 0.0 }
 0x1be   :  { %v400_v40 = vpack.c.bf16 %v385_v37, %v384_v36 }
 0x1bf   :  { %v558_v41 = vpop.f32.mrb[20].mxu1  ;;  %v399_v42 = vpack.c.bf16 %v383_v39, %v382_v38 }
 0x1c0   :  { %v344_v43 = vadd.f32 %v558_v41, %v475_v27  ;;  %v335_v44 = vpop.f32.mrb[21].mxu1 }
 0x1c1   :  { %v336_v45 = vadd.f32 %v475_v27, %v335_v44  ;;  %569 = vmatpush3.bf16.xpose.msra.mxu0 %v399_v42  ;;  %v559_v46 = vpop.f32.mrb[22].mxu1 }
 0x1c2   :  { %v388_v47 = vmax.f32 %v344_v43, 0.0  ;;  %v347_v48 = vadd.f32 %v559_v46, %v475_v27  ;;  %v338_v49 = vpop.f32.mrb[23].mxu1  ;;  %570 = vmatprep.subr.bf16.mxu0 %v624_v26 }
 0x1c3   :  { %v386_v50 = vmax.f32 %v336_v45, 0.0  ;;  %v339_v51 = vadd.f32 %v475_v27, %v338_v49 }
 0x1c4   :  { %v389_v52 = vmax.f32 %v347_v48, 0.0 }
 0x1c5   :  { %v387_v53 = vmax.f32 %v339_v51, 0.0 }
 0x1c6   :  { %v402_v54 = vpack.c.bf16 %v389_v52, %v388_v47 }
 0x1c7   :  { %v401_v55 = vpack.c.bf16 %v387_v53, %v386_v50  ;;  %v562_v56 = vpop.f32.mrb[24].mxu1 }
 0x1c8   :  { %v360_v57 = vadd.f32 %v562_v56, %v475_v27  ;;  %v351_v58 = vpop.f32.mrb[25].mxu1 }
 0x1c9   :  { %571 = vmatpush3.bf16.xpose.msra.mxu0 %v400_v40  ;;  %v352_v59 = vadd.f32 %v475_v27, %v351_v58  ;;  %v563_v60 = vpop.f32.mrb[26].mxu1 }
 0x1ca   :  { %v392_v61 = vmax.f32 %v360_v57, 0.0  ;;  %572 = vmatprep.subr.bf16.mxu0 %v624_v26  ;;  %v363_v62 = vadd.f32 %v563_v60, %v475_v27  ;;  %v354_v63 = vpop.f32.mrb[27].mxu1 }
 0x1cb   :  { %v390_v0 = vmax.f32 %v352_v59, 0.0  ;;  %v355_v1 = vadd.f32 %v475_v27, %v354_v63 }
 0x1cc   :  { %v393_v2 = vmax.f32 %v363_v62, 0.0 }
 0x1cd   :  { %v391_v3 = vmax.f32 %v355_v1, 0.0 }
 0x1ce   :  { %v404_v4 = vpack.c.bf16 %v393_v2, %v392_v61 }
 0x1cf   :  { %v403_v5 = vpack.c.bf16 %v391_v3, %v390_v0  ;;  %v566_v6 = vpop.f32.mrb[28].mxu1 }
 0x1d0   :  { %v376_v7 = vadd.f32 %v566_v6, %v475_v27  ;;  %v367_v8 = vpop.f32.mrb[29].mxu1 }
 0x1d1   :  { %573 = vmatpush3.bf16.xpose.msra.mxu0 %v401_v55  ;;  %v368_v9 = vadd.f32 %v475_v27, %v367_v8  ;;  %v567_v10 = vpop.f32.mrb[30].mxu1 }
 0x1d2   :  { %574 = vmatprep.subr.bf16.mxu0 %v624_v26  ;;  %v396_v11 = vmax.f32 %v376_v7, 0.0  ;;  %v379_v12 = vadd.f32 %v567_v10, %v475_v27  ;;  %v370_v13 = vpop.f32.mrb[31].mxu1 }
 0x1d3   :  { %v394_v14 = vmax.f32 %v368_v9, 0.0  ;;  %v371_v15 = vadd.f32 %v475_v27, %v370_v13 }
 0x1d4   :  { %v397_v16 = vmax.f32 %v379_v12, 0.0 }
 0x1d5   :  { %v395_v17 = vmax.f32 %v371_v15, 0.0 }
 0x1d6   :  { %v406_v18 = vpack.c.bf16 %v397_v16, %v396_v11 }
 0x1d7   :  { %v405_v19 = vpack.c.bf16 %v395_v17, %v394_v14 }
 0x1d9   :  { %575 = vmatpush3.bf16.xpose.msra.mxu0 %v402_v54 }
 0x1da   :  { %576 = vmatprep.subr.bf16.mxu0 %v624_v26 }
 0x1e1   :  { %577 = vmatpush3.bf16.xpose.msra.mxu0 %v403_v5 }
 0x1e2   :  { %578 = vmatprep.subr.bf16.mxu0 %v624_v26 }
 0x1e9   :  { %579 = vmatpush3.bf16.xpose.msra.mxu0 %v404_v4 }
 0x1ea   :  { %580 = vmatprep.subr.bf16.mxu0 %v624_v26 }
 0x1f1   :  { %581 = vmatpush3.bf16.xpose.msra.mxu0 %v405_v19 }
 0x1f2   :  { %582 = vmatprep.subr.bf16.mxu0 %v624_v26 }
 0x1f9   :  { %583 = vmatpush3.bf16.xpose.msra.mxu0 %v406_v18 }
 0x200   :  { %585 = vmatmul.mubr.bf16.vlgmr.msra.gmra.mrb[0].mxu0 %v398_v20 }
 0x2d3   :  { %v441_v22 = vpop.f32.mrb[0].mxu0 }
 0x2d4   :  { %v449_v23 = vadd.f32 %v448_v21, %v441_v22  ;;  %v586_v24 = vpop.f32.mrb[1].mxu0 }
 0x2d5   :  { %v444_v25 = vpop.f32.mrb[2].mxu0 }
 0x2d6   :  { %450 = vst [vmem:[#allocation3] sm:$0x1] %v449_v23  ;;  %v587_v27 = vpop.f32.mrb[3].mxu0 }
 0x2d7   :  { %611 = shalt.err (!%p608_p4)
}
 0x2d8   :  { %s612_s6 = scalar_lea.hbm %s790_s7, 16 }
 0x2d9   :  { %p613_p5 = scmp.ne.s32.totalorder %s790_s7, %s612_s6  ;;  %p616_p6 = scmp.lt.u32.totalorder %s612_s6, %s790_s7 }
 0x2db   :  { %p618_p7 = pnand %p616_p6, %p613_p5 }
 0x2dd   :  { %621 = shalt.err (!%p618_p7)
}
 0x2de   :  { %460 = dma.vmem_to_hbm [thread:$0]  %s458_s8, 16, %s790_s7, [#allocation4]  }
 0x2df   :  { %622 = dma.done.wait [#allocation4], 16  }
 0x2e0   :  { %623 = vsyncadd [#allocation4], 4294967280 }
 0x2e1   :  { %464 = vsyncpa [#allocation4], 1 }

</bundles_post_ra>
